<compile_context>
chip_gen: v7x
topology: tpu7x:2x2x1
jax: 0.10.0
libtpu: 0.0.40
codegen_flags: <defaults>
</compile_context>

<pallas_src>
import math

import jax
import jax.numpy as jnp
from jax.experimental import pallas as pl
from jax.experimental.pallas import tpu as pltpu


def _static_fbs_kernel(x_ref, attn_ref, o_ref):
    # x_ref: (TM, lane) tile; attn_ref: (1, lane) shared scale; o_ref: (TM, lane)
    o_ref[...] = x_ref[...] * attn_ref[...]


def _sublane_for_dtype(dtype) -> int:
    itemsize = jnp.dtype(dtype).itemsize
    if itemsize == 1:
        return 32
    if itemsize == 2:
        return 16
    return 8


def static_fbs(x: jax.Array, static_channel_attention: jax.Array) -> jax.Array:
    """Pallas implementation of StaticFBS.forward.

    Args:
      x: (B, S, C) activations.
      static_channel_attention: (1, C) per-channel scale.
    Returns:
      (B, S, C) = x * attn broadcast over batch and sequence.
    """
    assert static_channel_attention.ndim == 2
    assert static_channel_attention.shape[0] == 1
    B, S, C = x.shape
    assert static_channel_attention.shape[1] == C

    # Follow torch's type promotion (e.g. bf16 x * f32 attn -> f32 result).
    out_dtype = jnp.result_type(x.dtype, static_channel_attention.dtype)
    x = x.astype(out_dtype)
    attn = static_channel_attention.astype(out_dtype)

    total = B * S * C
    dtype_bytes = jnp.dtype(out_dtype).itemsize
    sublane = _sublane_for_dtype(out_dtype)

    # ---- Lane-dense layout selection -------------------------------------
    MAX_FOLD_LANE = 64 * 1024  # cap on folded lane width (elements)
    if C % 128 == 0:
        layout = "direct"
        lane = C
        attn_row = attn
        x2d = x.reshape(total // lane, lane)
    else:
        L = (C * 128) // math.gcd(C, 128)  # lcm(C, 128)
        if L <= MAX_FOLD_LANE:
            # Fold several channel vectors into one lane-dense row; pad the
            # flattened array so every row is full (padding sliced off later).
            layout = "fold"
            lane = L
            attn_row = jnp.tile(attn, (1, L // C))
            x_flat = x.reshape(-1)
            pad = (-total) % L
            if pad:
                x_flat = jnp.pad(x_flat, (0, pad))
            x2d = x_flat.reshape(x_flat.size // lane, lane)
        else:
            # Pathologically large lcm: pad the channel dim to a multiple of
            # 128 instead (small extra HBM traffic, still unmasked stores).
            layout = "padC"
            lane = ((C + 127) // 128) * 128
            attn_row = jnp.pad(attn, ((0, 0), (0, lane - C)))
            x2d = jnp.pad(x.reshape(B * S, C), ((0, 0), (0, lane - C)))
    rows = x2d.shape[0]

    # ---- VMEM budget / tile sizing ----------------------------------------
    try:
        vmem_capacity = int(pltpu.get_tpu_info().vmem_capacity_bytes)
    except Exception:
        vmem_capacity = 64 * 1024 * 1024  # assume the smallest (v7x per-TC)
    vmem_limit = min(vmem_capacity * 3 // 4, 64 * 1024 * 1024)
    # 2 pipeline buffers x (x tile + out tile) plus headroom -> limit // 6.
    max_tile_bytes = max(512 * 1024, vmem_limit // 6)

    # Row-tile size: purely byte-driven (no arbitrary row cap), rounded down
    # to the dtype-native sublane multiple.
    tm = max(sublane, max_tile_bytes // (lane * dtype_bytes))
    tm = (tm // sublane) * sublane
    if tm >= rows:
        tm = rows  # full first dim: always a legal block shape
    elif rows % tm != 0:
        # Prefer a tile count that divides rows evenly (avoids a padded /
        # masked tail block), but do not shrink below half the target.
        t = tm - sublane
        floor = max(sublane, tm // 2)
        while t >= floor:
            if rows % t == 0:
                tm = t
                break
            t -= sublane
    grid_rows = pl.cdiv(rows, tm)

    cost = pl.CostEstimate(
        flops=total,
        transcendentals=0,
        bytes_accessed=2 * total * dtype_bytes + lane * dtype_bytes,
    )

    out2d = pl.pallas_call(
        _static_fbs_kernel,
        out_shape=jax.ShapeDtypeStruct((rows, lane), out_dtype),
        grid_spec=pltpu.PrefetchScalarGridSpec(
            num_scalar_prefetch=0,
            grid=(grid_rows,),
            in_specs=[
                pl.BlockSpec((tm, lane), lambda i: (i, 0)),  # x row tile
                pl.BlockSpec((1, lane), lambda i: (0, 0)),   # shared attn row
            ],
            out_specs=pl.BlockSpec((tm, lane), lambda i: (i, 0)),
        ),
        compiler_params=pltpu.CompilerParams(
            # "parallel" lets Mosaic shard the row loop across TensorCores on
            # multi-TC parts; it is a no-op on single-TC v5e/v6e.
            # TODO(synk): verify 2-TC split on v7x in xprof; if only one TC is
            # busy, switch to (pltpu.CORE_PARALLEL,).
            dimension_semantics=("parallel",),
            vmem_limit_bytes=vmem_limit,
        ),
        cost_estimate=cost,
    )(x2d, attn_row)

    if layout == "direct":
        return out2d.reshape(B, S, C)
    if layout == "fold":
        return out2d.reshape(-1)[:total].reshape(B, S, C)
    # layout == "padC"
    return out2d[:, :C].reshape(B, S, C)


if __name__ == "__main__":
    key = jax.random.PRNGKey(0)
    kx, ka = jax.random.split(key)

    B, S, C = 2, 8, 32
    x = jax.random.normal(kx, (B, S, C), dtype=jnp.float32)
    # Deterministic "static channel attention" parameter, shape (1, C),
    # values in [0, 1] like a gating/attention output.
    static_channel_attention = jax.nn.sigmoid(
        jax.random.normal(ka, (1, C), dtype=jnp.float32)
    )

    out = static_fbs(x, static_channel_attention)
    out = jax.block_until_ready(out)

    # Reference check (plain JAX, matches torch broadcast semantics).
    ref = x * static_channel_attention[:, None, :]
    assert out.shape == (B, S, C)
    assert jnp.allclose(out, ref, atol=1e-6, rtol=1e-6)

    print("KERNEL_OK")
</pallas_src>

<mosaic_0001>
module attributes {stable_mosaic.version = 11 : i64} {
  func.func @_static_fbs_kernel(%arg0: i32, %arg1: memref<4x128xf32, #tpu.memory_space<vmem>>, %arg2: memref<1x128xf32, #tpu.memory_space<vmem>>, %arg3: memref<4x128xf32, #tpu.memory_space<vmem>>) attributes {dimension_semantics = [#tpu.dimension_semantics<parallel>], iteration_bounds = array<i64: 1>, scalar_prefetch = 0 : i64, scratch_operands = 0 : i64, tpu.core_type = #tpu.core_type<tc>, window_params = [{transform_indices = @transform_0, window_bounds = array<i64: 4, 128>}, {pipeline_mode = #tpu.pipeline_mode<synchronous>, transform_indices = @transform_1, window_bounds = array<i64: 1, 128>}, {transform_indices = @transform_2, window_bounds = array<i64: 4, 128>}]} {
    %c0 = arith.constant 0 : index
    %c0_0 = arith.constant 0 : index
    %0 = vector.load %arg1[%c0, %c0_0] : memref<4x128xf32, #tpu.memory_space<vmem>>, vector<4x128xf32>
    %c0_1 = arith.constant 0 : index
    %c0_2 = arith.constant 0 : index
    %1 = vector.load %arg2[%c0_1, %c0_2] : memref<1x128xf32, #tpu.memory_space<vmem>>, vector<1x128xf32>
    %2 = vector.broadcast %1 : vector<1x128xf32> to vector<4x128xf32>
    %3 = arith.mulf %0, %2 : vector<4x128xf32>
    %c0_3 = arith.constant 0 : index
    %c0_4 = arith.constant 0 : index
    %4 = vector.load %arg3[%c0_3, %c0_4] : memref<4x128xf32, #tpu.memory_space<vmem>>, vector<4x128xf32>
    tpu.vector_store %arg3[%c0_3, %c0_4], %3 {strides = array<i32>} : memref<4x128xf32, #tpu.memory_space<vmem>>, vector<4x128xf32>,
    return
  }
  func.func @transform_0(%arg0: i32) -> (i32, i32) {
    %c0_i32 = arith.constant 0 : i32
    %c0_i32_0 = arith.constant 0 : i32
    return %arg0, %c0_i32 : i32, i32
  }
  func.func @transform_1(%arg0: i32) -> (i32, i32) {
    %c0_i32 = arith.constant 0 : i32
    %c0_i32_0 = arith.constant 0 : i32
    %c0_i32_1 = arith.constant 0 : i32
    return %c0_i32, %c0_i32_0 : i32, i32
  }
  func.func @transform_2(%arg0: i32) -> (i32, i32) {
    %c0_i32 = arith.constant 0 : i32
    %c0_i32_0 = arith.constant 0 : i32
    return %arg0, %c0_i32 : i32, i32
  }
}

</mosaic_0001>

<bundles_post_ra>
// kernel: tpu_custom_call.1
= control target key start
LH: loop header
LB: loop body
LE: loop exit
PB: predicated region body
PF: predicated region fallthrough
CT: control target
= control target key end

     0   :  { %7 = vsyncpa [#allocation3], 0  ;;  %s144_s0 = inlined_call_operand.hbm [shape: f32[4,128], index: 0, kind: input, shape index: {}]   ;;  %s145_s1 = inlined_call_operand.vmem [shape: f32[1,128], index: 1, kind: input, shape index: {}]   ;;  %s146_s2 = inlined_call_operand.hbm [shape: f32[4,128], index: 2, kind: output, shape index: {}]  }
   0x1   :  { %8 = vsyncpa [#allocation4], 0  ;;  %s100_s9 = smov [#allocation2]   ;;  %s52_s13 = scalar_lea.hbm %s144_s0, 64 }
   0x2   :  { %s15_s10 = sshll.u32 %s100_s9, 4  ;;  %p53_p0 = scmp.ne.s32.totalorder %s144_s0, %s52_s13  ;;  %s16_s10 = int_to_ptr.vmem [resolvable:$true] %s15_s10 }
   0x3   :  { %p56_p1 = scmp.lt.u32.totalorder %s52_s13, %s144_s0 }
   0x5   :  { %p58_p2 = pnand %p56_p1, %p53_p0 }
   0x7   :  { %61 = shalt.err (!%p58_p2)
}
   0x8   :  { %s62_s18 = scalar_lea.vmem %s16_s10, 64  ;;  %p67_p4 = scmp.lt.s32.totalorder %s16_s10, %s16_s10 }
   0x9   :  { %p63_p3 = scmp.ne.s32.totalorder %s16_s10, %s62_s18  ;;  %p68_p5 = scmp.lt.s32.totalorder %s62_s18, %s62_s18 }
   0xb   :  { %p69_p6 = por %p68_p5, %p67_p4 }
   0xd   :  { %p70_p7 = pnand %p69_p6, %p63_p3 }
   0xf   :  { %73 = shalt.err (!%p70_p7)
}
  0x10   :  { %18 = dma.hbm_to_vmem [thread:$0]  %s144_s0, 64, %s16_s10, [#allocation3]  }
  0x11   :  { %96 = dma.done.wait [#allocation3], 64  }
  0x12   :  { %97 = vsyncadd [#allocation3], 4294967232  ;;  %s101_s21 = smov [#allocation5]   ;;  %v24_v0 = vld [vmem:[#allocation2] sm:$0xf] }
  0x13   :  { %s40_s22 = sshll.u32 %s101_s21, 4  ;;  %v49_v1 = vld [vmem:[%s145_s1] ss:$0 sm:$0xff]  ;;  %s41_s22 = int_to_ptr.vmem [resolvable:$true] %s40_s22 }
  0x14   :  { %v32_v2 = vmul.f32 %v49_v1, %v24_v0  ;;  %s74_s25 = scalar_lea.vmem %s41_s22, 64  ;;  %p79_p9 = scmp.lt.s32.totalorder %s41_s22, %s41_s22 }
  0x15   :  { %p75_p8 = scmp.ne.s32.totalorder %s41_s22, %s74_s25  ;;  %p80_p10 = scmp.lt.s32.totalorder %s74_s25, %s74_s25 }
  0x16   :  { %33 = vst [vmem:[#allocation5] sm:$0xf] %v32_v2 }
  0x17   :  { %p81_p11 = por %p80_p10, %p79_p9 }
  0x19   :  { %p82_p12 = pnand %p81_p11, %p75_p8 }
  0x1b   :  { %85 = shalt.err (!%p82_p12)
}
  0x1c   :  { %s86_s27 = scalar_lea.hbm %s146_s2, 64 }
  0x1d   :  { %p87_p13 = scmp.ne.s32.totalorder %s146_s2, %s86_s27  ;;  %p90_p0 = scmp.lt.u32.totalorder %s86_s27, %s146_s2 }
  0x1f   :  { %p92_p1 = pnand %p90_p0, %p87_p13 }
  0x21   :  { %95 = shalt.err (!%p92_p1)
}
  0x22   :  { %43 = dma.vmem_to_hbm [thread:$0]  %s41_s22, 64, %s146_s2, [#allocation4]  }
  0x23   :  { %98 = dma.done.wait [#allocation4], 64  }
  0x24   :  { %99 = vsyncadd [#allocation4], 4294967232 }
  0x25   :  { %47 = vsyncpa [#allocation3], 1 }
  0x26   :  { %48 = vsyncpa [#allocation4], 1 }

</bundles_post_ra>
